<compile_context>
chip_gen: v7x
topology: tpu7x:2x2x1
jax: 0.10.0
libtpu: 0.0.40
codegen_flags: <defaults>
</compile_context>

<pallas_src>
import functools
import numpy as np
import jax
import jax.numpy as jnp
from jax.experimental import pallas as pl
from jax.experimental.pallas import tpu as pltpu


# --------------------------------------------------------------------------
# Config (small, deterministic, consistent with the module's __init__)
# --------------------------------------------------------------------------
CFG = dict(
    hid_feature=16,
    num_tfmamba=2,
    attention_reduce_out_channels=4,
    attention_embed_dim=64,          # = F * attention_reduce_out_channels
    attention_num_heads=4,
    attention_positional_enccoding_len=8,
)

VMEM_LIMIT_BYTES = 32 * 1024 * 1024   # safe on v5e/v6e (128 MiB phys) and v7x (64 MiB)


def _mosaic_params():
    return pltpu.CompilerParams(
        dimension_semantics=("parallel",),
        vmem_limit_bytes=VMEM_LIMIT_BYTES,
    )


# --------------------------------------------------------------------------
# Fused pointwise-conv + InstanceNorm2d(affine) + PReLU (+ optional residual)
# --------------------------------------------------------------------------
def _fused_pw_kernel(*refs, cin, has_res):
    if has_res:
        x_ref, r_ref, w_ref, b_ref, g_ref, be_ref, a_ref, o_ref = refs
    else:
        x_ref, w_ref, b_ref, g_ref, be_ref, a_ref, o_ref = refs

    x = x_ref[0]                 # [Cin, N]   (N = T*F, lane-dense)
    w = w_ref[...]               # [Cout, Cin]

    # Pointwise conv as unrolled VPU broadcast-FMAs (Cin is tiny & static).
    acc = w[:, 0:1] * x[0:1, :] + b_ref[...]
    for c in range(1, cin):
        acc = acc + w[:, c:c + 1] * x[c:c + 1, :]

    # InstanceNorm2d (biased variance, eps=1e-5) over T*F, per (b, c), one-pass stats.
    mean = jnp.mean(acc, axis=-1, keepdims=True)
    msq = jnp.mean(acc * acc, axis=-1, keepdims=True)
    var = msq - mean * mean
    y = (acc - mean) * jax.lax.rsqrt(var + 1e-5) * g_ref[...] + be_ref[...]

    # Per-channel PReLU.
    y = jnp.where(y >= 0.0, y, a_ref[...] * y)

    if has_res:
        y = y + r_ref[0]
    o_ref[0] = y


def fused_pw_norm_prelu(x, w, b, gamma, beta, alpha, residual=None):
    """x [B, Cin, N] -> [B, Cout, N]; w [Cout, Cin]; optional residual [B, Cout, N]."""
    B, Cin, N = x.shape
    Cout = w.shape[0]
    has_res = residual is not None
    kernel = functools.partial(_fused_pw_kernel, cin=Cin, has_res=has_res)

    col = lambda v: v.reshape(-1, 1).astype(jnp.float32)
    x_spec = pl.BlockSpec((1, Cin, N), lambda i: (i, 0, 0))
    o_spec = pl.BlockSpec((1, Cout, N), lambda i: (i, 0, 0))
    p_specs = [pl.BlockSpec((Cout, Cin), lambda i: (0, 0))] + \
              [pl.BlockSpec((Cout, 1), lambda i: (0, 0)) for _ in range(4)]

    in_specs = [x_spec] + ([o_spec] if has_res else []) + p_specs
    args = [x.astype(jnp.float32)]
    if has_res:
        args.append(residual.astype(jnp.float32))
    args += [w.astype(jnp.float32), col(b), col(gamma), col(beta), col(alpha)]

    return pl.pallas_call(
        kernel,
        grid=(B,),
        in_specs=in_specs,
        out_specs=o_spec,
        out_shape=jax.ShapeDtypeStruct((B, Cout, N), jnp.float32),
        compiler_params=_mosaic_params(),
    )(*args)


# --------------------------------------------------------------------------
# Fused multi-head self-attention (pos-emb + QKV proj + per-head SDPA + out proj)
# --------------------------------------------------------------------------
def _mha_kernel(x_ref, pe_ref, wqkv_ref, bqkv_ref, wo_ref, bo_ref, o_ref,
                qkv_scr, head_scr, *, num_heads, scale):
    E = x_ref.shape[2]
    dh = E // num_heads

    x = x_ref[0] + pe_ref[...]                                  # [T, E] f32
    qkv_scr[...] = (
        jnp.dot(x.astype(jnp.bfloat16), wqkv_ref[...],
                preferred_element_type=jnp.float32)
        + bqkv_ref[...]
    )                                                           # [T, 3E]

    for h in range(num_heads):                                  # static, small
        q = qkv_scr[:, h * dh:(h + 1) * dh] * scale             # scale folded into q
        k = qkv_scr[:, E + h * dh:E + (h + 1) * dh]
        v = qkv_scr[:, 2 * E + h * dh:2 * E + (h + 1) * dh]
        s = jax.lax.dot_general(                                # q @ k^T  [T, T]
            q.astype(jnp.bfloat16), k.astype(jnp.bfloat16),
            (((1,), (1,)), ((), ())),
            preferred_element_type=jnp.float32)
        m = jnp.max(s, axis=-1, keepdims=True)
        p = jnp.exp(s - m)
        l = jnp.sum(p, axis=-1, keepdims=True)
        p = p * pl.reciprocal(l, approx=True)                   # EUP slot
        head_scr[:, h * dh:(h + 1) * dh] = jnp.dot(
            p.astype(jnp.bfloat16), v.astype(jnp.bfloat16),
            preferred_element_type=jnp.float32)

    o_ref[0] = (
        jnp.dot(head_scr[...].astype(jnp.bfloat16), wo_ref[...],
                preferred_element_type=jnp.float32)
        + bo_ref[...]
    )


def fused_mha(x_seq, pe, w_in, b_in, w_out, b_out, num_heads):
    """nn.MultiheadAttention(batch_first=True) self-attention. x_seq [B, T, E]."""
    B, T, E = x_seq.shape
    dh = E // num_heads
    scale = 1.0 / float(np.sqrt(dh))
    kernel = functools.partial(_mha_kernel, num_heads=num_heads, scale=scale)

    return pl.pallas_call(
        kernel,
        grid=(B,),
        in_specs=[
            pl.BlockSpec((1, T, E), lambda i: (i, 0, 0)),
            pl.BlockSpec((T, E), lambda i: (0, 0)),
            pl.BlockSpec((E, 3 * E), lambda i: (0, 0)),
            pl.BlockSpec((1, 3 * E), lambda i: (0, 0)),
            pl.BlockSpec((E, E), lambda i: (0, 0)),
            pl.BlockSpec((1, E), lambda i: (0, 0)),
        ],
        out_specs=pl.BlockSpec((1, T, E), lambda i: (i, 0, 0)),
        out_shape=jax.ShapeDtypeStruct((B, T, E), jnp.float32),
        scratch_shapes=[pltpu.VMEM((T, 3 * E), jnp.float32),
                        pltpu.VMEM((T, E), jnp.float32)],
        compiler_params=_mosaic_params(),
    )(x_seq.astype(jnp.float32), pe.astype(jnp.float32),
      w_in.T.astype(jnp.bfloat16), b_in.reshape(1, -1).astype(jnp.float32),
      w_out.T.astype(jnp.bfloat16), b_out.reshape(1, -1).astype(jnp.float32))


# --------------------------------------------------------------------------
# Fused decoder (3 pointwise convs) + sigmoid mask + mag/complex assembly
# --------------------------------------------------------------------------
def _decoder_final_kernel(x_ref, nmag_ref, w_ref, b_ref,
                          mag_ref, pre_ref, pim_ref, cr_ref, ci_ref, *, cin):
    x = x_ref[0]                                  # [C, N]
    w = w_ref[...]                                # [3, C]  rows = (mask, phase_re, phase_im)

    acc = w[:, 0:1] * x[0:1, :] + b_ref[...]
    for c in range(1, cin):
        acc = acc + w[:, c:c + 1] * x[c:c + 1, :]

    mask = jax.nn.sigmoid(acc[0:1, :])            # [1, N]
    p_re = acc[1:2, :]
    p_im = acc[2:3, :]
    mag = mask * nmag_ref[0]                      # [1, N]

    # cos/sin of atan2(p_im, p_re) computed directly (atan2(0,0)=0 convention preserved).
    rsq = p_re * p_re + p_im * p_im
    r = jnp.sqrt(rsq)
    nz = rsq > 0.0
    safe_r = jnp.where(nz, r, 1.0)
    cos_p = jnp.where(nz, p_re / safe_r, 1.0)
    sin_p = jnp.where(nz, p_im / safe_r, 0.0)

    mag_ref[0] = mag
    pre_ref[0] = p_re
    pim_ref[0] = p_im
    cr_ref[0] = mag * cos_p
    ci_ref[0] = mag * sin_p


def fused_decoder_final(x, nmag_flat, w_dec, b_dec):
    """x [B, C, N], nmag_flat [B, N] -> (mag, p_re, p_im, com_r, com_i) each [B, 1, N]."""
    B, C, N = x.shape
    kernel = functools.partial(_decoder_final_kernel, cin=C)
    x_spec = pl.BlockSpec((1, C, N), lambda i: (i, 0, 0))
    row_spec = pl.BlockSpec((1, 1, N), lambda i: (i, 0, 0))
    return pl.pallas_call(
        kernel,
        grid=(B,),
        in_specs=[x_spec, row_spec,
                  pl.BlockSpec((3, C), lambda i: (0, 0)),
                  pl.BlockSpec((3, 1), lambda i: (0, 0))],
        out_specs=tuple(row_spec for _ in range(5)),
        out_shape=tuple(jax.ShapeDtypeStruct((B, 1, N), jnp.float32) for _ in range(5)),
        compiler_params=_mosaic_params(),
    )(x.astype(jnp.float32), nmag_flat.reshape(B, 1, N).astype(jnp.float32),
      w_dec.astype(jnp.float32), b_dec.reshape(3, 1).astype(jnp.float32))


# --------------------------------------------------------------------------
# Params / positional embedding
# --------------------------------------------------------------------------
def sinusoids_jax(length, channels, max_timescale=10000):
    assert channels % 2 == 0
    log_timescale_increment = np.log(max_timescale) / (channels // 2 - 1)
    inv_timescales = jnp.exp(-log_timescale_increment * jnp.arange(channels // 2))
    scaled_time = jnp.arange(length)[:, None].astype(jnp.float32) * inv_timescales[None, :]
    return jnp.concatenate([jnp.sin(scaled_time), jnp.cos(scaled_time)], axis=1)


def init_params(key, cfg):
    H = cfg['hid_feature']
    Cr = cfg['attention_reduce_out_channels']
    E = cfg['attention_embed_dim']
    ks = jax.random.split(key, 12)
    n = lambda k, shape, s=0.1: s * jax.random.normal(k, shape, jnp.float32)
    p = {}
    # dense encoder stand-in
    p['w_enc'] = n(ks[0], (H, 2)); p['b_enc'] = n(ks[1], (H,))
    p['g_enc'] = jnp.ones((H,)); p['be_enc'] = jnp.zeros((H,)); p['a_enc'] = jnp.full((H,), 0.25)
    # reduce: Conv2d(H->Cr, k=1) + InstanceNorm2d(affine) + PReLU(Cr)
    p['w_red'] = n(ks[2], (Cr, H)); p['b_red'] = n(ks[3], (Cr,))
    p['g_red'] = jnp.ones((Cr,)); p['be_red'] = jnp.zeros((Cr,)); p['a_red'] = jnp.full((Cr,), 0.25)
    # MultiheadAttention
    p['w_in'] = n(ks[4], (3 * E, E)); p['b_in'] = jnp.zeros((3 * E,))
    p['w_out'] = n(ks[5], (E, E)); p['b_out'] = jnp.zeros((E,))
    # expand: Conv2d(Cr->H, k=1) + InstanceNorm2d(affine) + PReLU(H)
    p['w_exp'] = n(ks[6], (H, Cr)); p['b_exp'] = n(ks[7], (H,))
    p['g_exp'] = jnp.ones((H,)); p['be_exp'] = jnp.zeros((H,)); p['a_exp'] = jnp.full((H,), 0.25)
    # decoder stand-ins (mask logit, phase real, phase imag) packed into one [3, H] weight
    p['w_mask'] = n(ks[8], (1, H)); p['b_mask'] = jnp.zeros((1,))
    p['w_pr'] = n(ks[9], (1, H)); p['b_pr'] = jnp.zeros((1,))
    p['w_pi'] = n(ks[10], (1, H)); p['b_pi'] = jnp.zeros((1,))
    # sinusoidal positional embedding buffer
    p['pos_emb'] = sinusoids_jax(cfg['attention_positional_enccoding_len'], E)
    return p


# --------------------------------------------------------------------------
# Forward
# --------------------------------------------------------------------------
def semamba_co2d_reat_forward(noisy_mag, noisy_pha, params, cfg):
    """noisy_mag, noisy_pha: [B, F, T] -> (mag [B,F,T], pha [B,F,T], com [B,F,T,2])."""
    B, F, T = noisy_mag.shape
    N = T * F

    # 'b f t -> b t f', flattened to the lane-dense [B, C, T*F] internal layout.
    mag_flat = jnp.transpose(noisy_mag, (0, 2, 1)).reshape(B, N)
    pha_flat = jnp.transpose(noisy_pha, (0, 2, 1)).reshape(B, N)
    x = jnp.stack([mag_flat, pha_flat], axis=1)                     # [B, 2, N]

    # TODO(synk): reference DenseEncoder (dilated DenseBlock + F-downsampling conv) is not
    # provided; stand-in = fused 1x1 conv + InstanceNorm2d + PReLU.
    x = fused_pw_norm_prelu(x, params['w_enc'], params['b_enc'],
                            params['g_enc'], params['be_enc'], params['a_enc'])

    num_blocks = cfg['num_tfmamba']
    for block_i in range(num_blocks):
        if block_i == num_blocks // 2:
            # --- reduce (fused conv + norm + PReLU) ---
            x_pre = fused_pw_norm_prelu(x, params['w_red'], params['b_red'],
                                        params['g_red'], params['be_red'], params['a_red'])
            Cr = x_pre.shape[1]
            assert F * Cr == cfg['attention_embed_dim']
            # 'b c t f -> b t (f c)'
            x_seq = (x_pre.reshape(B, Cr, T, F)
                          .transpose(0, 2, 3, 1)
                          .reshape(B, T, F * Cr))
            # positional embedding (repeat if too short)
            pe = params['pos_emb']
            if T > pe.shape[0]:
                rep = T // pe.shape[0] + 1
                pe = jnp.tile(pe, (rep, 1))
            pe = pe[:T]
            # --- fused self-attention (pos-emb + QKV + SDPA + out proj) ---
            x_att = fused_mha(x_seq, pe, params['w_in'], params['b_in'],
                              params['w_out'], params['b_out'],
                              cfg['attention_num_heads'])
            # 'b t (f c) -> b c t f'
            x_att = (x_att.reshape(B, T, F, Cr)
                          .transpose(0, 3, 1, 2)
                          .reshape(B, Cr, N))
            # --- expand (fused conv + norm + PReLU + residual add) ---
            x = fused_pw_norm_prelu(x_att, params['w_exp'], params['b_exp'],
                                    params['g_exp'], params['be_exp'], params['a_exp'],
                                    residual=x)
        # TODO(synk): TFMambaBlock (Mamba SSM over time & frequency) is not provided in
        # the reference source; treated as identity here.
        x = x

    # TODO(synk): reference MagDecoder / PhaseDecoder (DenseBlock + upsample +
    # LearnableSigmoid / dual-conv atan2) are not provided; stand-ins = fused 1x1 convs.
    w_dec = jnp.concatenate([params['w_mask'], params['w_pr'], params['w_pi']], axis=0)  # [3, H]
    b_dec = jnp.concatenate([params['b_mask'], params['b_pr'], params['b_pi']], axis=0)  # [3]
    mag, p_re, p_im, com_r, com_i = fused_decoder_final(x, mag_flat, w_dec, b_dec)

    # TODO(synk): atan2 kept in XLA glue (Mosaic lowering for atan2 not guaranteed);
    # in-kernel cos/sin use the algebraically identical p_re/r, p_im/r form.
    pha = jnp.arctan2(p_im, p_re)                                   # [B, 1, N]

    def to_bft(z):                                                  # [B,1,N] -> [B,F,T]
        return jnp.transpose(z.reshape(B, T, F), (0, 2, 1))

    denoised_mag = to_bft(mag)
    denoised_pha = to_bft(pha)
    denoised_com = jnp.stack([to_bft(com_r), to_bft(com_i)], axis=-1)   # [B,F,T,2]
    return denoised_mag, denoised_pha, denoised_com


# --------------------------------------------------------------------------
if __name__ == "__main__":
    key = jax.random.PRNGKey(0)
    B, F, T = 2, 16, 8
    k1, k2, kp = jax.random.split(key, 3)
    noisy_mag = jnp.abs(jax.random.normal(k1, (B, F, T), jnp.float32))
    noisy_pha = jax.random.uniform(k2, (B, F, T), jnp.float32,
                                   minval=-np.pi, maxval=np.pi)
    params = init_params(kp, CFG)

    d_mag, d_pha, d_com = semamba_co2d_reat_forward(noisy_mag, noisy_pha, params, CFG)
    jax.block_until_ready((d_mag, d_pha, d_com))

    assert d_mag.shape == (B, F, T)
    assert d_pha.shape == (B, F, T)
    assert d_com.shape == (B, F, T, 2)
    assert bool(jnp.all(jnp.isfinite(d_mag)))
    assert bool(jnp.all(jnp.isfinite(d_pha)))
    assert bool(jnp.all(jnp.isfinite(d_com)))
    print("KERNEL_OK")
</pallas_src>

<mosaic_0001>
module attributes {stable_mosaic.version = 11 : i64} {
  func.func @_fused_pw_kernel(%arg0: i32, %arg1: memref<1x2x128xf32, #tpu.memory_space<vmem>>, %arg2: memref<16x2xf32, #tpu.memory_space<vmem>>, %arg3: memref<16x1xf32, #tpu.memory_space<vmem>>, %arg4: memref<16x1xf32, #tpu.memory_space<vmem>>, %arg5: memref<16x1xf32, #tpu.memory_space<vmem>>, %arg6: memref<16x1xf32, #tpu.memory_space<vmem>>, %arg7: memref<1x16x128xf32, #tpu.memory_space<vmem>>) attributes {dimension_semantics = [#tpu.dimension_semantics<parallel>], iteration_bounds = array<i64: 2>, scalar_prefetch = 0 : i64, scratch_operands = 0 : i64, tpu.core_type = #tpu.core_type<tc>, window_params = [{transform_indices = @transform_0, window_bounds = array<i64: 1, 2, 128>}, {pipeline_mode = #tpu.pipeline_mode<synchronous>, transform_indices = @transform_1, window_bounds = array<i64: 16, 2>}, {pipeline_mode = #tpu.pipeline_mode<synchronous>, transform_indices = @transform_2, window_bounds = array<i64: 16, 1>}, {pipeline_mode = #tpu.pipeline_mode<synchronous>, transform_indices = @transform_3, window_bounds = array<i64: 16, 1>}, {pipeline_mode = #tpu.pipeline_mode<synchronous>, transform_indices = @transform_4, window_bounds = array<i64: 16, 1>}, {pipeline_mode = #tpu.pipeline_mode<synchronous>, transform_indices = @transform_5, window_bounds = array<i64: 16, 1>}, {transform_indices = @transform_6, window_bounds = array<i64: 1, 16, 128>}]} {
    %c0 = arith.constant 0 : index
    %c0_0 = arith.constant 0 : index
    %c0_1 = arith.constant 0 : index
    %0 = vector.load %arg1[%c0, %c0_0, %c0_1] : memref<1x2x128xf32, #tpu.memory_space<vmem>>, vector<1x2x128xf32>
    %1 = vector.shape_cast %0 : vector<1x2x128xf32> to vector<2x128xf32>
    %c0_2 = arith.constant 0 : index
    %c0_3 = arith.constant 0 : index
    %2 = vector.load %arg2[%c0_2, %c0_3] : memref<16x2xf32, #tpu.memory_space<vmem>>, vector<16x2xf32>
    %3 = vector.extract_strided_slice %2 {offsets = [0, 0], sizes = [16, 1], strides = [1, 1]} : vector<16x2xf32> to vector<16x1xf32>
    %4 = vector.extract_strided_slice %1 {offsets = [0, 0], sizes = [1, 128], strides = [1, 1]} : vector<2x128xf32> to vector<1x128xf32>
    %5 = vector.broadcast %3 : vector<16x1xf32> to vector<16x128xf32>
    %6 = vector.broadcast %4 : vector<1x128xf32> to vector<16x128xf32>
    %7 = arith.mulf %5, %6 : vector<16x128xf32>
    %c0_4 = arith.constant 0 : index
    %c0_5 = arith.constant 0 : index
    %8 = vector.load %arg3[%c0_4, %c0_5] : memref<16x1xf32, #tpu.memory_space<vmem>>, vector<16x1xf32>
    %9 = vector.broadcast %8 : vector<16x1xf32> to vector<16x128xf32>
    %10 = arith.addf %7, %9 : vector<16x128xf32>
    %11 = vector.extract_strided_slice %2 {offsets = [0, 1], sizes = [16, 1], strides = [1, 1]} : vector<16x2xf32> to vector<16x1xf32>
    %12 = vector.extract_strided_slice %1 {offsets = [1, 0], sizes = [1, 128], strides = [1, 1]} : vector<2x128xf32> to vector<1x128xf32>
    %13 = vector.broadcast %11 : vector<16x1xf32> to vector<16x128xf32>
    %14 = vector.broadcast %12 : vector<1x128xf32> to vector<16x128xf32>
    %15 = arith.mulf %13, %14 : vector<16x128xf32>
    %16 = arith.addf %10, %15 : vector<16x128xf32>
    %cst = arith.constant dense<0.000000e+00> : vector<16xf32>
    %17 = vector.multi_reduction <add>, %16, %cst [1] : vector<16x128xf32> to vector<16xf32>
    %18 = vector.shape_cast %17 : vector<16xf32> to vector<16x1xf32>
    %cst_6 = arith.constant 1.280000e+02 : f32
    %19 = vector.broadcast %cst_6 : f32 to vector<16x1xf32>
    %20 = arith.divf %18, %19 : vector<16x1xf32>
    %21 = arith.mulf %16, %16 : vector<16x128xf32>
    %cst_7 = arith.constant dense<0.000000e+00> : vector<16xf32>
    %22 = vector.multi_reduction <add>, %21, %cst_7 [1] : vector<16x128xf32> to vector<16xf32>
    %23 = vector.shape_cast %22 : vector<16xf32> to vector<16x1xf32>
    %cst_8 = arith.constant 1.280000e+02 : f32
    %24 = vector.broadcast %cst_8 : f32 to vector<16x1xf32>
    %25 = arith.divf %23, %24 : vector<16x1xf32>
    %26 = arith.mulf %20, %20 : vector<16x1xf32>
    %27 = arith.subf %25, %26 : vector<16x1xf32>
    %28 = vector.broadcast %20 : vector<16x1xf32> to vector<16x128xf32>
    %29 = arith.subf %16, %28 : vector<16x128xf32>
    %cst_9 = arith.constant 9.99999974E-6 : f32
    %30 = vector.broadcast %cst_9 : f32 to vector<16x1xf32>
    %31 = arith.addf %27, %30 : vector<16x1xf32>
    %32 = math.rsqrt %31 : vector<16x1xf32>
    %33 = vector.broadcast %32 : vector<16x1xf32> to vector<16x128xf32>
    %34 = arith.mulf %29, %33 : vector<16x128xf32>
    %c0_10 = arith.constant 0 : index
    %c0_11 = arith.constant 0 : index
    %35 = vector.load %arg4[%c0_10, %c0_11] : memref<16x1xf32, #tpu.memory_space<vmem>>, vector<16x1xf32>
    %36 = vector.broadcast %35 : vector<16x1xf32> to vector<16x128xf32>
    %37 = arith.mulf %34, %36 : vector<16x128xf32>
    %c0_12 = arith.constant 0 : index
    %c0_13 = arith.constant 0 : index
    %38 = vector.load %arg5[%c0_12, %c0_13] : memref<16x1xf32, #tpu.memory_space<vmem>>, vector<16x1xf32>
    %39 = vector.broadcast %38 : vector<16x1xf32> to vector<16x128xf32>
    %40 = arith.addf %37, %39 : vector<16x128xf32>
    %cst_14 = arith.constant 0.000000e+00 : f32
    %41 = vector.broadcast %cst_14 : f32 to vector<16x128xf32>
    %42 = arith.cmpf oge, %40, %41 : vector<16x128xf32>
    %c0_15 = arith.constant 0 : index
    %c0_16 = arith.constant 0 : index
    %43 = vector.load %arg6[%c0_15, %c0_16] : memref<16x1xf32, #tpu.memory_space<vmem>>, vector<16x1xf32>
    %44 = vector.broadcast %43 : vector<16x1xf32> to vector<16x128xf32>
    %45 = arith.mulf %44, %40 : vector<16x128xf32>
    %46 = arith.select %42, %40, %45 : vector<16x128xi1>, vector<16x128xf32>
    %c0_17 = arith.constant 0 : index
    %c0_18 = arith.constant 0 : index
    %c0_19 = arith.constant 0 : index
    %47 = vector.load %arg7[%c0_17, %c0_18, %c0_19] : memref<1x16x128xf32, #tpu.memory_space<vmem>>, vector<1x16x128xf32>
    %48 = vector.shape_cast %47 : vector<1x16x128xf32> to vector<16x128xf32>
    %49 = vector.shape_cast %46 : vector<16x128xf32> to vector<1x16x128xf32>
    tpu.vector_store %arg7[%c0_17, %c0_18, %c0_19], %49 {strides = array<i32>} : memref<1x16x128xf32, #tpu.memory_space<vmem>>, vector<1x16x128xf32>,
    return
  }
  func.func @transform_0(%arg0: i32) -> (i32, i32, i32) {
    %c0_i32 = arith.constant 0 : i32
    %c0_i32_0 = arith.constant 0 : i32
    %c0_i32_1 = arith.constant 0 : i32
    return %arg0, %c0_i32, %c0_i32_0 : i32, i32, i32
  }
  func.func @transform_1(%arg0: i32) -> (i32, i32) {
    %c0_i32 = arith.constant 0 : i32
    %c0_i32_0 = arith.constant 0 : i32
    %c0_i32_1 = arith.constant 0 : i32
    return %c0_i32, %c0_i32_0 : i32, i32
  }
  func.func @transform_2(%arg0: i32) -> (i32, i32) {
    %c0_i32 = arith.constant 0 : i32
    %c0_i32_0 = arith.constant 0 : i32
    %c0_i32_1 = arith.constant 0 : i32
    return %c0_i32, %c0_i32_0 : i32, i32
  }
  func.func @transform_3(%arg0: i32) -> (i32, i32) {
    %c0_i32 = arith.constant 0 : i32
    %c0_i32_0 = arith.constant 0 : i32
    %c0_i32_1 = arith.constant 0 : i32
    return %c0_i32, %c0_i32_0 : i32, i32
  }
  func.func @transform_4(%arg0: i32) -> (i32, i32) {
    %c0_i32 = arith.constant 0 : i32
    %c0_i32_0 = arith.constant 0 : i32
    %c0_i32_1 = arith.constant 0 : i32
    return %c0_i32, %c0_i32_0 : i32, i32
  }
  func.func @transform_5(%arg0: i32) -> (i32, i32) {
    %c0_i32 = arith.constant 0 : i32
    %c0_i32_0 = arith.constant 0 : i32
    %c0_i32_1 = arith.constant 0 : i32
    return %c0_i32, %c0_i32_0 : i32, i32
  }
  func.func @transform_6(%arg0: i32) -> (i32, i32, i32) {
    %c0_i32 = arith.constant 0 : i32
    %c0_i32_0 = arith.constant 0 : i32
    %c0_i32_1 = arith.constant 0 : i32
    return %arg0, %c0_i32, %c0_i32_0 : i32, i32, i32
  }
}

</mosaic_0001>

<bundles_post_ra>
// kernel: tpu_custom_call.1
= control target key start
LH: loop header
LB: loop body
LE: loop exit
PB: predicated region body
PF: predicated region fallthrough
CT: control target
= control target key end

     0   :  { %11 = vsyncpa [#allocation3], 0  ;;  %s753_s0 = inlined_call_operand.vmem [shape: f32[2,2,128], index: 0, kind: input, shape index: {}]   ;;  %s754_s1 = inlined_call_operand.vmem [shape: f32[16,2], index: 1, kind: input, shape index: {}]   ;;  %s755_s2 = inlined_call_operand.vmem [shape: f32[16,1], index: 2, kind: input, shape index: {}]   ;;  %s756_s3 = inlined_call_operand.vmem [shape: f32[16,1], index: 3, kind: input, shape index: {}]   ;;  %s757_s4 = inlined_call_operand.vmem [shape: f32[16,1], index: 4, kind: input, shape index: {}]   ;;  %s758_s5 = inlined_call_operand.vmem [shape: f32[16,1], index: 5, kind: input, shape index: {}]   ;;  %s759_s6 = inlined_call_operand.hbm [shape: f32[2,16,128], index: 6, kind: output, shape index: {}]  }
   0x1   :  { %13 = vsyncpa [#allocation3 + $0x1], 0  ;;  %s616_s21 = smov 0   ;;  %s618_s22 = smov 0  }
   0x2   :  { %s620_s23 = smov 0   ;;  %s622_s24 = smov 0  }
   0x3 LB: > { %s637_s25 = sadd.s32 4294967295, %s574_s24   ;;  %s447_s26 = sadd.s32 4294967294, %s574_s24   ;;  %s574_s24 = sphi %s622_s24, %s765_s24   ;;  %s570_s23 = sphi %s620_s23, %s764_s23   ;;  %s566_s22 = sphi %s618_s22, %s763_s22   ;;  %s562_s21 = sphi %s616_s21, %s762_s21  }
   0x4   : > { %s641_s27 = sadd.s32 1, %s574_s24   ;;  %s157_s28 = sadd.s32 1, %s570_s23 }
   0x5   : > { %s154_s29 = ssub.s32 %s574_s24, %s641_s27  ;;  %p167_p0 = scmp.ne.s32.totalorder %s570_s23, %s566_s22 }
   0x6   : > { %p155_p1 = scmp.eq.s32.totalorder %s154_s29, 0  ;;  %p168_p2 = scmp.eq.s32.totalorder %s637_s25, 1 }
   0x7   : > { %p173_p3 = scmp.ne.s32.totalorder %s566_s22, %s562_s21  ;;  %p174_p4 = scmp.eq.s32.totalorder %s447_s26, 1 }
   0x8   : > { %s652_s30 = scalar_select %p155_p1, %s570_s23, %s157_s28  }
   0x9   : > { %p654_p5 = por %p168_p2, %p167_p0  ;;  %p658_p6 = por %p174_p4, %p173_p3 }
   0xa   : > { %p450_p7 = scmp.ge.s32.totalorder %s574_s24, 1  ;;  %p214_p8 = scmp.lt.s32.totalorder %s574_s24, 3 }
   0xc   : > { %p215_p9 = pnand %p450_p7, %p214_p8 }
   0xd   : > { %v266_v0 = vld [vmem:[%s755_s2] sm:$0xff] (!%p215_p9)  ;;  %v576_v2 = vmov (!%p215_p9), 0   ;;  %v267_v3 = vld [vmem:[%s755_s2 + $0x8] sm:$0xff] (!%p215_p9)  ;;  %v577_v5 = vmov (!%p215_p9), 1   ;;  %p243_p10 = scmp.lt.s32.totalorder (!%p215_p9), %s637_s25, 1  ;;  %v260_v6 = vlaneseq (!%p215_p9)  ;;  %s240_s19 = sand.u32 (!%p215_p9), 1, %s566_s22  }
   0xe   : > { %218 = sbr.rel (%p215_p9) target bundleno = 404 (0x194), region = 44  ;;  %v248_v1 = vld [vmem:[%s754_s1] sm:$0xff] (!%p215_p9)  ;;  %503 = vset.pattern.permute.xlu1 (!%p215_p9), %v576_v2  ;;  %502 = vset.pattern.permute.xlu0 (!%p215_p9), %v576_v2  ;;  %v249_v4 = vld [vmem:[%s754_s1 + $0x8] sm:$0xff] (!%p215_p9)  ;;  %s451_s20 = sshll.u32 (!%p215_p9), %s240_s19, 4 }
   0xf   : > { %270 = vperm.xlu1 (!%p215_p9), %503, %v266_v0   ;;  %252 = vperm.xlu0 (!%p215_p9), %502, %v248_v1   ;;  %v261_v7 = vshrl.u32 (!%p215_p9), %v260_v6, 7  ;;  %v324_v28 = vld [vmem:[%s756_s3 + $0x8] sm:$0xff] (!%p215_p9)  ;;  %v337_v29 = vld [vmem:[%s757_s4] sm:$0xff] (!%p215_p9)  ;;  %s458_s28 = sshll.u32 (!%p215_p9), %s637_s25, 8  ;;  %s712_s12 = scalar_lea.sflag (!%p215_p9), [#allocation3], %s240_s19 }
  0x10   : > { %v338_v30 = vld [vmem:[%s757_s4 + $0x8] sm:$0xff] (!%p215_p9)  ;;  %v323_v31 = vld [vmem:[%s756_s3] sm:$0xff] (!%p215_p9)  ;;  %s706_s11 = scalar_lea.hbm (!%p215_p9), %s759_s6, %s458_s28  ;;  %s578_s13 = smov (!%p215_p9), [#allocation2]  }
  0x11   : > { %v262_v8 = vsub.s32 (!%p215_p9), 0, %v261_v7  ;;  %v290_v13 = vsub.s32 (!%p215_p9), 1, %v261_v7  ;;  %v353_v32 = vld [vmem:[%s758_s5] sm:$0xff] (!%p215_p9)  ;;  %v354_v34 = vld [vmem:[%s758_s5 + $0x8] sm:$0xff] (!%p215_p9)  ;;  %s516_s14 = sshll.u32 (!%p215_p9), %s578_s13, 4  ;;  %s517_s14 = int_to_ptr.vmem [resolvable:$false] %s516_s14 }
  0x12   : > { %s518_s15 = scalar_lea.vmem (!%p215_p9), %s517_s14, 512 }
  0x13   : > { %275 = vperm.xlu1 (!%p215_p9), %503, %v267_v3   ;;  %257 = vperm.xlu0 (!%p215_p9), %502, %v249_v4  }
  0x15   : > { %s244_s17 = scalar_select %p243_p10, %s637_s25, 1 }
  0x17   : > { %505 = vset.pattern.permute.xlu1 %v577_v5  ;;  %504 = vset.pattern.permute.xlu0 %v577_v5  ;;  %s452_s18 = sshll.u32 %s244_s17, 1 }
  0x18   : > { %285 = vperm.xlu1 %505, %v249_v4   ;;  %281 = vperm.xlu0 %504, %v248_v1   ;;  %s246_s26 = scalar_lea.vmem %s753_s0, %s452_s18 }
  0x19   : > { %v247_v9 = vld [vmem:[%s246_s26] sm:$0x3]  ;;  %s242_s26 = scalar_lea.vmem [#allocation2], %s451_s20 }
  0x1a   : > { %v263_v12 = vrot.slane %v247_v9, %v262_v8  ;;  %v291_v18 = vrot.slane %v247_v9, %v290_v13  ;;  %s385_s29 = sshll.u32 %s242_s26, 4  ;;  %s708_s29 = int_to_ptr.vmem [resolvable:$true] %s385_s29 }
  0x1b   : > { %s512_s25 = scalar_lea.vmem %s708_s29, 256  ;;  %p519_p0 = scmp.lt.s32.totalorder %s708_s29, %s517_s14 }
  0x1c   : > { %507 = vset.pattern.permute.xlu1 %v576_v2  ;;  %506 = vset.pattern.permute.xlu0 %v576_v2  ;;  %p513_p11 = scmp.ne.s32.totalorder %s708_s29, %s512_s25  ;;  %p520_p1 = scmp.lt.s32.totalorder %s518_s15, %s512_s25 }
  0x1e   : > { %p514_p12 = pnand %p513_p11, %p654_p5  ;;  %p521_p2 = por %p520_p1, %p519_p0 }
  0x20   : > { %p515_p13 = pneg %p514_p12 }
  0x22   : > { %p522_p3 = pnand %p521_p2, %p515_p13 }
  0x8e   : > { %v253_v10 = vpop.permute.xlu0 %252  ;;  %v271_v11 = vpop.permute.xlu1 %270 }
  0x8f   : > { %v264_v16 = vmul.f32 %v263_v12, %v253_v10 }
  0x91   : > { %v278_v21 = vadd.f32 %v271_v11, %v264_v16 }
  0x92   : > { %v258_v14 = vpop.permute.xlu0 %257  ;;  %v276_v15 = vpop.permute.xlu1 %275 }
  0x93   : > { %v265_v17 = vmul.f32 %v263_v12, %v258_v14 }
  0x95   : > { %v279_v22 = vadd.f32 %v276_v15, %v265_v17 }
  0x97   : > { %v286_v19 = vpop.permute.xlu1 %285  ;;  %v282_v20 = vpop.permute.xlu0 %281 }
  0x98   : > { %v293_v23 = vmul.f32 %v291_v18, %v286_v19  ;;  %v292_v24 = vmul.f32 %v291_v18, %v282_v20 }
  0x9a   : > { %v295_v25 = vadd.f32 %v293_v23, %v279_v22  ;;  %v294_v26 = vadd.f32 %v292_v24, %v278_v21 }
  0x9c   : > { %298 = vadd.xlane.f32.xlu0 %v295_v25  ;;  %296 = vadd.xlane.f32.xlu1 %v294_v26  ;;  %v303_v27 = vmul.f32 %v294_v26, %v294_v26  ;;  %v304_v33 = vmul.f32 %v295_v25, %v295_v25 }
  0xa0   : > { %305 = vadd.xlane.f32.xlu0 %v303_v27 }
  0xad   : > { %332 = vperm.xlu1 %507, %v324_v28  }
  0xb1   : > { %341 = vperm.xlu1 %507, %v337_v29  }
  0xb5   : > { %346 = vperm.xlu1 %507, %v338_v30  }
  0xb6   : > { %327 = vperm.xlu0 %506, %v323_v31  }
  0xb9   : > { %357 = vperm.xlu1 %507, %v353_v32  }
  0xdd   : > { %307 = vadd.xlane.f32.xlu1 %v304_v33 }
  0xee   : > { %362 = vperm.xlu1 %507, %v354_v34  }
 0x129   : > { %v299_v35 = vpop.xlane.xlu0 %298  ;;  %v297_v36 = vpop.xlane.xlu1 %296 }
 0x12a   : > { %v301_v37 = vmul.f32 0.0078125, %v297_v36  ;;  %v302_v55 = vmul.f32 0.0078125, %v299_v35 }
 0x12c   : > { %v311_v39 = vmul.f32 %v301_v37, %v301_v37  ;;  %v315_v45 = vsub.f32 %v294_v26, %v301_v37  ;;  %v312_v57 = vmul.f32 %v302_v55, %v302_v55  ;;  %v316_v61 = vsub.f32 %v295_v25, %v302_v55 }
 0x12d   : > { %v306_v38 = vpop.xlane.xlu0 %305  ;;  %v333_v42 = vpop.permute.xlu1 %332 }
 0x12e   : > { %v309_v40 = vmul.f32 0.0078125, %v306_v38 }
 0x130   : > { %v313_v41 = vsub.f32 %v309_v40, %v311_v39 }
 0x131   : > { %v342_v44 = vpop.permute.xlu1 %341 }
 0x132   : > { %v317_v43 = vadd.f32 1e-05, %v313_v41 }
 0x134   : > { %508 = vrsqrt.f32 %v317_v43 }
 0x135   : > { %v347_v47 = vpop.permute.xlu1 %346  ;;  %v328_v48 = vpop.permute.xlu0 %327 }
 0x139   : > { %v358_v52 = vpop.permute.xlu1 %357 }
 0x13e   : > { %v509_v46 = vpop.eup %508 }
 0x13f   : > { %v321_v49 = vmul.f32 %v509_v46, %v315_v45 }
 0x141   : > { %v335_v50 = vmul.f32 %v328_v48, %v321_v49 }
 0x143   : > { %v349_v51 = vadd.f32 %v342_v44, %v335_v50 }
 0x145   : > { %vm351_vm0 = vcmp.ge.f32.partialorder %v349_v51, 0.0  ;;  %v365_v53 = vmul.f32 %v358_v52, %v349_v51 }
 0x147   : > { %v367_v54 = vsel %vm351_vm0, %v349_v51, %v365_v53 }
 0x148   : > { %369 = vst [vmem:[%s242_s26] sm:$0xff] %v367_v54 }
 0x16a   : > { %v308_v56 = vpop.xlane.xlu1 %307 }
 0x16b   : > { %v310_v58 = vmul.f32 0.0078125, %v308_v56 }
 0x16d   : > { %v314_v59 = vsub.f32 %v310_v58, %v312_v57 }
 0x16e   : > { %v363_v2 = vpop.permute.xlu1 %362 }
 0x16f   : > { %v318_v60 = vadd.f32 1e-05, %v314_v59 }
 0x171   : > { %510 = vrsqrt.f32 %v318_v60 }
 0x17b   : > { %v511_v62 = vpop.eup %510 }
 0x17c   : > { %v322_v63 = vmul.f32 %v511_v62, %v316_v61 }
 0x17e   : > { %v336_v0 = vmul.f32 %v333_v42, %v322_v63 }
 0x180   : > { %v350_v1 = vadd.f32 %v347_v47, %v336_v0 }
 0x182   : > { %vm352_vm1 = vcmp.ge.f32.partialorder %v350_v1, 0.0  ;;  %v366_v3 = vmul.f32 %v363_v2, %v350_v1 }
 0x184   : > { %v368_v4 = vsel %vm352_vm1, %v350_v1, %v366_v3 }
 0x185   : > { %370 = vst [vmem:[%s242_s26 + $0x8] sm:$0xff] %v368_v4 }
 0x186   : > { %525 = shalt.err (!%p522_p3)
}
 0x187   : > { %s526_s16 = scalar_lea.hbm %s706_s11, 256  ;;  %s530_s19 = scalar_lea.hbm %s759_s6, 512 }
 0x188   : > { %p527_p4 = scmp.ne.s32.totalorder %s706_s11, %s526_s16  ;;  %p531_p9 = scmp.lt.u32.totalorder %s706_s11, %s759_s6 }
 0x189   : > { %p532_p10 = scmp.lt.u32.totalorder %s530_s19, %s526_s16  ;;  %p534_p12 = scmp.lt.u32.totalorder %s526_s16, %s706_s11 }
 0x18a   : > { %p528_p7 = pnand %p527_p4, %p654_p5 }
 0x18b   : > { %p533_p11 = por %p532_p10, %p531_p9 }
 0x18c   : > { %p529_p8 = pneg %p528_p7 }
 0x18d   : > { %p535_p13 = por %p534_p12, %p533_p11 }
 0x18f   : > { %p536_p0 = pnand %p535_p13, %p529_p8 }
 0x191   : > { %539 = shalt.err (!%p536_p0)
}
 0x192   : > { %s579_s28 = smov 128   ;;  %s580_s9 = smov 8  }
 0x193   : > { %459 = dma.vmem_to_hbm [thread:$0]  (%p654_p5), %s708_s29, 256, %s706_s11, %s712_s12, %s579_s28, %s579_s28, %s580_s9  }
 0x194 PF: > { %p465_p1 = scmp.ge.s32.totalorder %s574_s24, 2  ;;  %s400_s10 = sand.u32 1, %s562_s21  }
 0x195   : > { %s401_s25 = scalar_lea.sflag [#allocation3], %s400_s10 }
 0x196   : > { %p462_p2 = pnand %p465_p1, %p658_p6 }
 0x198   : > { %557 = dma.done.wait (!%p462_p2), %s401_s25, 256  }
 0x199   : > { %559 = vsyncadd (!%p462_p2), %s401_s25, 4294967040  ;;  %p16_p3 = scmp.ge.s32.totalorder %s641_s27, 4   ;;  %s762_s21 = smov %s566_s22 }
 0x19a   : > { %s763_s22 = smov %s570_s23  ;;  %s764_s23 = smov %s652_s30 }
 0x19b   : > { %s765_s24 = smov %s641_s27  ;;  %18 = sbr.rel (!%p16_p3) target bundleno = 3 (0x3), region = 79 }
 0x1a2   :  { %406 = vsyncpa [#allocation3], 1 }
 0x1a3   :  { %408 = vsyncpa [#allocation3 + $0x1], 1 }

</bundles_post_ra>
